<compile_context>
chip_gen: v6e
topology: v6e:2x2x1
jax: 0.10.0
libtpu: 0.0.40
codegen_flags: <defaults>
</compile_context>

<pallas_src>
import functools

import jax
import jax.numpy as jnp
from jax import lax
from jax.experimental import pallas as pl
from jax.experimental.pallas import tpu as pltpu

N_IN, N_HID, N_OUT = 5, 5, 4
_SUB = 8          # f32 sublane count; feature dims padded to 8 for dense slabs
_MAX_TB = 65536   # lane-tile cap: ~5 MiB of double-buffered I/O per block
_CHUNK = 1024     # in-kernel lane chunk: whole 3-layer MLP stays in vregs


def _pick_tile(B, batch_tile):
    """Per-grid-step batch (lane) tile."""
    if batch_tile is not None:
        if batch_tile >= B:
            return B                      # single block; full-dim block is legal
        assert batch_tile % 128 == 0, "batch_tile must be a multiple of 128 when it tiles the batch"
        return batch_tile
    if B <= 256:
        return B
    half = -(-B // 2)                     # >=2 blocks so v7x megacore splits the grid
    tb = 128 * (-(-half // 128))
    return min(tb, _MAX_TB)


def _pick_chunk(tb):
    chunk = min(tb, _CHUNK)
    while tb % chunk:
        chunk //= 2
    return chunk


def _make_kernel(tb, chunk):
    n_chunks = tb // chunk

    def kernel(x_ref, w1_ref, b1_ref, w2_ref, b2_ref, w3_ref, b3_ref, o_ref):
        # Weights/biases: tiny, loaded once per grid step (hoisted out of the chunk loop).
        w1, b1 = w1_ref[...], b1_ref[...]          # (8, 8) W^T [out, in], (8, 1)
        w2, b2 = w2_ref[...], b2_ref[...]
        w3, b3 = w3_ref[...], b3_ref[...]

        def dense(h, w, b, n_in, act):
            # h: (>=n_in, CH); w: (8, 8); b: (8, 1)  ->  (8, CH) dense slab
            z = h[0:1, :] * w[:, 0:1]              # sublane-bcast row * lane-bcast column
            for k in range(1, n_in):
                z = z + h[k:k + 1, :] * w[:, k:k + 1]
            z = z + b
            return jax.nn.sigmoid(z) if act else z  # one dense EUP pass per layer

        def compute(off):
            xc = x_ref[:, pl.ds(off, chunk)]        # (5, CH) lane-dense load
            h1 = dense(xc, w1, b1, N_IN, True)
            h2 = dense(h1, w2, b2, N_HID, True)
            y = dense(h2, w3, b3, N_HID, False)
            o_ref[:, pl.ds(off, chunk)] = y[0:N_OUT, :]   # direct store, no concatenate

        if n_chunks == 1:
            compute(0)
        else:
            def body(c, carry):
                compute(pl.multiple_of(c * chunk, chunk))
                return carry
            lax.fori_loop(0, n_chunks, body, 0)

    return kernel


def _pad_wt(w, b):
    """w: (in, out), b: (out,) -> W^T padded to (8, 8), bias padded to (8, 1)."""
    n_in, n_out = w.shape
    wt = jnp.zeros((_SUB, _SUB), jnp.float32).at[:n_out, :n_in].set(w.T.astype(jnp.float32))
    bp = jnp.zeros((_SUB, 1), jnp.float32).at[:n_out, 0].set(b.astype(jnp.float32))
    return wt, bp


@functools.partial(jax.jit, static_argnames=("batch_tile",))
def sas_model_forward_fb(x_fb, params, *, batch_tile=None):
    """(features, batch) interface: x_fb (5, B) -> (4, B).  No boundary transposes."""
    B = x_fb.shape[1]
    tb = _pick_tile(B, batch_tile)
    chunk = _pick_chunk(tb)
    n_blocks = -(-B // tb)
    b_pad = n_blocks * tb

    x_fb = x_fb.astype(jnp.float32)
    if b_pad != B:
        # TODO(synk): the ragged last block could use in-kernel masking instead of this pad copy.
        x_fb = jnp.pad(x_fb, ((0, 0), (0, b_pad - B)))

    w1, b1 = _pad_wt(params["w1"], params["b1"])
    w2, b2 = _pad_wt(params["w2"], params["b2"])
    w3, b3 = _pad_wt(params["w3"], params["b3"])

    const = lambda i: (0, 0)
    out = pl.pallas_call(
        _make_kernel(tb, chunk),
        out_shape=jax.ShapeDtypeStruct((N_OUT, b_pad), jnp.float32),
        grid=(n_blocks,),
        in_specs=[
            pl.BlockSpec((N_IN, tb), lambda i: (0, i)),     # x tile, pipelined over batch
            pl.BlockSpec((_SUB, _SUB), const), pl.BlockSpec((_SUB, 1), const),   # W1^T, b1
            pl.BlockSpec((_SUB, _SUB), const), pl.BlockSpec((_SUB, 1), const),   # W2^T, b2
            pl.BlockSpec((_SUB, _SUB), const), pl.BlockSpec((_SUB, 1), const),   # W3^T, b3
        ],
        out_specs=pl.BlockSpec((N_OUT, tb), lambda i: (0, i)),
        compiler_params=pltpu.CompilerParams(
            dimension_semantics=("parallel",),              # batch blocks across TCs (v7x)
            vmem_limit_bytes=32 * 1024 * 1024,              # explicit; fits v5e/v6e/v7x
        ),
    )(x_fb, w1, b1, w2, b2, w3, b3)
    return out[:, :B]


@functools.partial(jax.jit, static_argnames=("batch_tile",))
def sas_model_forward(x, params, *, batch_tile=None):
    """PyTorch-layout interface: x (B, 5) -> (B, 4)."""
    out_fb = sas_model_forward_fb(x.astype(jnp.float32).T, params, batch_tile=batch_tile)
    return out_fb.T


def init_params(key):
    """Deterministic init mirroring nn.Linear shapes: fc1(5,5), fc2(5,5), fc3(5,4)."""
    ks = jax.random.split(key, 6)

    def linear(kw, kb, fan_in, fan_out):
        bound = 1.0 / jnp.sqrt(fan_in)
        w = jax.random.uniform(kw, (fan_in, fan_out), jnp.float32, -bound, bound)
        b = jax.random.uniform(kb, (fan_out,), jnp.float32, -bound, bound)
        return w, b

    w1, b1 = linear(ks[0], ks[1], 5, 5)
    w2, b2 = linear(ks[2], ks[3], 5, 5)
    w3, b3 = linear(ks[4], ks[5], 5, 4)
    return {"w1": w1, "b1": b1, "w2": w2, "b2": b2, "w3": w3, "b3": b3}


def _reference(x, p):
    hp = jax.lax.Precision.HIGHEST
    h1 = jax.nn.sigmoid(jnp.dot(x, p["w1"], precision=hp) + p["b1"])
    h2 = jax.nn.sigmoid(jnp.dot(h1, p["w2"], precision=hp) + p["b2"])
    return jnp.dot(h2, p["w3"], precision=hp) + p["b3"]


if __name__ == "__main__":
    key = jax.random.PRNGKey(0)
    k_p, k1, k2, k3 = jax.random.split(key, 4)
    params = init_params(k_p)

    # 1) Small batch: single block, straight-line kernel.
    B = 8
    x = jax.random.normal(k1, (B, N_IN), jnp.float32)
    out = jax.block_until_ready(sas_model_forward(x, params))
    assert out.shape == (B, N_OUT)
    assert jnp.allclose(out, _reference(x, params), atol=1e-4, rtol=1e-4)

    # 2) Multi-block grid + batch padding (grid=(3,), tb=128).
    B2 = 260
    x2 = jax.random.normal(k2, (B2, N_IN), jnp.float32)
    out2 = jax.block_until_ready(sas_model_forward(x2, params, batch_tile=128))
    assert out2.shape == (B2, N_OUT)
    assert jnp.allclose(out2, _reference(x2, params), atol=1e-4, rtol=1e-4)

    # 3) Auto tile (>=2 blocks) + in-kernel chunk loop, using the transpose-free (5,B) API.
    B3 = 2500
    x3 = jax.random.normal(k3, (B3, N_IN), jnp.float32)
    out3_fb = jax.block_until_ready(sas_model_forward_fb(x3.T, params))
    assert out3_fb.shape == (N_OUT, B3)
    assert jnp.allclose(out3_fb.T, _reference(x3, params), atol=1e-4, rtol=1e-4)

    print("KERNEL_OK")
</pallas_src>

<mosaic_0001>
module attributes {stable_mosaic.version = 11 : i64} {
  func.func @kernel(%arg0: i32, %arg1: memref<5x8xf32, #tpu.memory_space<vmem>>, %arg2: memref<8x8xf32, #tpu.memory_space<vmem>>, %arg3: memref<8x1xf32, #tpu.memory_space<vmem>>, %arg4: memref<8x8xf32, #tpu.memory_space<vmem>>, %arg5: memref<8x1xf32, #tpu.memory_space<vmem>>, %arg6: memref<8x8xf32, #tpu.memory_space<vmem>>, %arg7: memref<8x1xf32, #tpu.memory_space<vmem>>, %arg8: memref<4x8xf32, #tpu.memory_space<vmem>>) attributes {dimension_semantics = [#tpu.dimension_semantics<parallel>], iteration_bounds = array<i64: 1>, scalar_prefetch = 0 : i64, scratch_operands = 0 : i64, tpu.core_type = #tpu.core_type<tc>, window_params = [{transform_indices = @transform_0, window_bounds = array<i64: 5, 8>}, {pipeline_mode = #tpu.pipeline_mode<synchronous>, transform_indices = @transform_1, window_bounds = array<i64: 8, 8>}, {pipeline_mode = #tpu.pipeline_mode<synchronous>, transform_indices = @transform_2, window_bounds = array<i64: 8, 1>}, {pipeline_mode = #tpu.pipeline_mode<synchronous>, transform_indices = @transform_3, window_bounds = array<i64: 8, 8>}, {pipeline_mode = #tpu.pipeline_mode<synchronous>, transform_indices = @transform_4, window_bounds = array<i64: 8, 1>}, {pipeline_mode = #tpu.pipeline_mode<synchronous>, transform_indices = @transform_5, window_bounds = array<i64: 8, 8>}, {pipeline_mode = #tpu.pipeline_mode<synchronous>, transform_indices = @transform_6, window_bounds = array<i64: 8, 1>}, {transform_indices = @transform_7, window_bounds = array<i64: 4, 8>}]} {
    %c0 = arith.constant 0 : index
    %c0_0 = arith.constant 0 : index
    %0 = vector.load %arg2[%c0, %c0_0] : memref<8x8xf32, #tpu.memory_space<vmem>>, vector<8x8xf32>
    %c0_1 = arith.constant 0 : index
    %c0_2 = arith.constant 0 : index
    %1 = vector.load %arg3[%c0_1, %c0_2] : memref<8x1xf32, #tpu.memory_space<vmem>>, vector<8x1xf32>
    %c0_3 = arith.constant 0 : index
    %c0_4 = arith.constant 0 : index
    %2 = vector.load %arg4[%c0_3, %c0_4] : memref<8x8xf32, #tpu.memory_space<vmem>>, vector<8x8xf32>
    %c0_5 = arith.constant 0 : index
    %c0_6 = arith.constant 0 : index
    %3 = vector.load %arg5[%c0_5, %c0_6] : memref<8x1xf32, #tpu.memory_space<vmem>>, vector<8x1xf32>
    %c0_7 = arith.constant 0 : index
    %c0_8 = arith.constant 0 : index
    %4 = vector.load %arg6[%c0_7, %c0_8] : memref<8x8xf32, #tpu.memory_space<vmem>>, vector<8x8xf32>
    %c0_9 = arith.constant 0 : index
    %c0_10 = arith.constant 0 : index
    %5 = vector.load %arg7[%c0_9, %c0_10] : memref<8x1xf32, #tpu.memory_space<vmem>>, vector<8x1xf32>
    %c0_11 = arith.constant 0 : index
    %c0_12 = arith.constant 0 : index
    %6 = vector.load %arg1[%c0_11, %c0_12] : memref<5x8xf32, #tpu.memory_space<vmem>>, vector<5x8xf32>
    %7 = vector.extract_strided_slice %6 {offsets = [0, 0], sizes = [1, 8], strides = [1, 1]} : vector<5x8xf32> to vector<1x8xf32>
    %8 = vector.extract_strided_slice %0 {offsets = [0, 0], sizes = [8, 1], strides = [1, 1]} : vector<8x8xf32> to vector<8x1xf32>
    %9 = vector.broadcast %7 : vector<1x8xf32> to vector<8x8xf32>
    %10 = vector.broadcast %8 : vector<8x1xf32> to vector<8x8xf32>
    %11 = arith.mulf %9, %10 : vector<8x8xf32>
    %12 = vector.extract_strided_slice %6 {offsets = [1, 0], sizes = [1, 8], strides = [1, 1]} : vector<5x8xf32> to vector<1x8xf32>
    %13 = vector.extract_strided_slice %0 {offsets = [0, 1], sizes = [8, 1], strides = [1, 1]} : vector<8x8xf32> to vector<8x1xf32>
    %14 = vector.broadcast %12 : vector<1x8xf32> to vector<8x8xf32>
    %15 = vector.broadcast %13 : vector<8x1xf32> to vector<8x8xf32>
    %16 = arith.mulf %14, %15 : vector<8x8xf32>
    %17 = arith.addf %11, %16 : vector<8x8xf32>
    %18 = vector.extract_strided_slice %6 {offsets = [2, 0], sizes = [1, 8], strides = [1, 1]} : vector<5x8xf32> to vector<1x8xf32>
    %19 = vector.extract_strided_slice %0 {offsets = [0, 2], sizes = [8, 1], strides = [1, 1]} : vector<8x8xf32> to vector<8x1xf32>
    %20 = vector.broadcast %18 : vector<1x8xf32> to vector<8x8xf32>
    %21 = vector.broadcast %19 : vector<8x1xf32> to vector<8x8xf32>
    %22 = arith.mulf %20, %21 : vector<8x8xf32>
    %23 = arith.addf %17, %22 : vector<8x8xf32>
    %24 = vector.extract_strided_slice %6 {offsets = [3, 0], sizes = [1, 8], strides = [1, 1]} : vector<5x8xf32> to vector<1x8xf32>
    %25 = vector.extract_strided_slice %0 {offsets = [0, 3], sizes = [8, 1], strides = [1, 1]} : vector<8x8xf32> to vector<8x1xf32>
    %26 = vector.broadcast %24 : vector<1x8xf32> to vector<8x8xf32>
    %27 = vector.broadcast %25 : vector<8x1xf32> to vector<8x8xf32>
    %28 = arith.mulf %26, %27 : vector<8x8xf32>
    %29 = arith.addf %23, %28 : vector<8x8xf32>
    %30 = vector.extract_strided_slice %6 {offsets = [4, 0], sizes = [1, 8], strides = [1, 1]} : vector<5x8xf32> to vector<1x8xf32>
    %31 = vector.extract_strided_slice %0 {offsets = [0, 4], sizes = [8, 1], strides = [1, 1]} : vector<8x8xf32> to vector<8x1xf32>
    %32 = vector.broadcast %30 : vector<1x8xf32> to vector<8x8xf32>
    %33 = vector.broadcast %31 : vector<8x1xf32> to vector<8x8xf32>
    %34 = arith.mulf %32, %33 : vector<8x8xf32>
    %35 = arith.addf %29, %34 : vector<8x8xf32>
    %36 = vector.broadcast %1 : vector<8x1xf32> to vector<8x8xf32>
    %37 = arith.addf %35, %36 : vector<8x8xf32>
    %38 = arith.negf %37 : vector<8x8xf32>
    %39 = math.exp %38 : vector<8x8xf32>
    %cst = arith.constant 1.000000e+00 : f32
    %40 = vector.broadcast %cst : f32 to vector<8x8xf32>
    %41 = arith.addf %40, %39 : vector<8x8xf32>
    %42 = arith.divf %40, %41 : vector<8x8xf32>
    %43 = vector.extract_strided_slice %42 {offsets = [0, 0], sizes = [1, 8], strides = [1, 1]} : vector<8x8xf32> to vector<1x8xf32>
    %44 = vector.extract_strided_slice %2 {offsets = [0, 0], sizes = [8, 1], strides = [1, 1]} : vector<8x8xf32> to vector<8x1xf32>
    %45 = vector.broadcast %43 : vector<1x8xf32> to vector<8x8xf32>
    %46 = vector.broadcast %44 : vector<8x1xf32> to vector<8x8xf32>
    %47 = arith.mulf %45, %46 : vector<8x8xf32>
    %48 = vector.extract_strided_slice %42 {offsets = [1, 0], sizes = [1, 8], strides = [1, 1]} : vector<8x8xf32> to vector<1x8xf32>
    %49 = vector.extract_strided_slice %2 {offsets = [0, 1], sizes = [8, 1], strides = [1, 1]} : vector<8x8xf32> to vector<8x1xf32>
    %50 = vector.broadcast %48 : vector<1x8xf32> to vector<8x8xf32>
    %51 = vector.broadcast %49 : vector<8x1xf32> to vector<8x8xf32>
    %52 = arith.mulf %50, %51 : vector<8x8xf32>
    %53 = arith.addf %47, %52 : vector<8x8xf32>
    %54 = vector.extract_strided_slice %42 {offsets = [2, 0], sizes = [1, 8], strides = [1, 1]} : vector<8x8xf32> to vector<1x8xf32>
    %55 = vector.extract_strided_slice %2 {offsets = [0, 2], sizes = [8, 1], strides = [1, 1]} : vector<8x8xf32> to vector<8x1xf32>
    %56 = vector.broadcast %54 : vector<1x8xf32> to vector<8x8xf32>
    %57 = vector.broadcast %55 : vector<8x1xf32> to vector<8x8xf32>
    %58 = arith.mulf %56, %57 : vector<8x8xf32>
    %59 = arith.addf %53, %58 : vector<8x8xf32>
    %60 = vector.extract_strided_slice %42 {offsets = [3, 0], sizes = [1, 8], strides = [1, 1]} : vector<8x8xf32> to vector<1x8xf32>
    %61 = vector.extract_strided_slice %2 {offsets = [0, 3], sizes = [8, 1], strides = [1, 1]} : vector<8x8xf32> to vector<8x1xf32>
    %62 = vector.broadcast %60 : vector<1x8xf32> to vector<8x8xf32>
    %63 = vector.broadcast %61 : vector<8x1xf32> to vector<8x8xf32>
    %64 = arith.mulf %62, %63 : vector<8x8xf32>
    %65 = arith.addf %59, %64 : vector<8x8xf32>
    %66 = vector.extract_strided_slice %42 {offsets = [4, 0], sizes = [1, 8], strides = [1, 1]} : vector<8x8xf32> to vector<1x8xf32>
    %67 = vector.extract_strided_slice %2 {offsets = [0, 4], sizes = [8, 1], strides = [1, 1]} : vector<8x8xf32> to vector<8x1xf32>
    %68 = vector.broadcast %66 : vector<1x8xf32> to vector<8x8xf32>
    %69 = vector.broadcast %67 : vector<8x1xf32> to vector<8x8xf32>
    %70 = arith.mulf %68, %69 : vector<8x8xf32>
    %71 = arith.addf %65, %70 : vector<8x8xf32>
    %72 = vector.broadcast %3 : vector<8x1xf32> to vector<8x8xf32>
    %73 = arith.addf %71, %72 : vector<8x8xf32>
    %74 = arith.negf %73 : vector<8x8xf32>
    %75 = math.exp %74 : vector<8x8xf32>
    %cst_13 = arith.constant 1.000000e+00 : f32
    %76 = vector.broadcast %cst_13 : f32 to vector<8x8xf32>
    %77 = arith.addf %76, %75 : vector<8x8xf32>
    %78 = arith.divf %76, %77 : vector<8x8xf32>
    %79 = vector.extract_strided_slice %78 {offsets = [0, 0], sizes = [1, 8], strides = [1, 1]} : vector<8x8xf32> to vector<1x8xf32>
    %80 = vector.extract_strided_slice %4 {offsets = [0, 0], sizes = [8, 1], strides = [1, 1]} : vector<8x8xf32> to vector<8x1xf32>
    %81 = vector.broadcast %79 : vector<1x8xf32> to vector<8x8xf32>
    %82 = vector.broadcast %80 : vector<8x1xf32> to vector<8x8xf32>
    %83 = arith.mulf %81, %82 : vector<8x8xf32>
    %84 = vector.extract_strided_slice %78 {offsets = [1, 0], sizes = [1, 8], strides = [1, 1]} : vector<8x8xf32> to vector<1x8xf32>
    %85 = vector.extract_strided_slice %4 {offsets = [0, 1], sizes = [8, 1], strides = [1, 1]} : vector<8x8xf32> to vector<8x1xf32>
    %86 = vector.broadcast %84 : vector<1x8xf32> to vector<8x8xf32>
    %87 = vector.broadcast %85 : vector<8x1xf32> to vector<8x8xf32>
    %88 = arith.mulf %86, %87 : vector<8x8xf32>
    %89 = arith.addf %83, %88 : vector<8x8xf32>
    %90 = vector.extract_strided_slice %78 {offsets = [2, 0], sizes = [1, 8], strides = [1, 1]} : vector<8x8xf32> to vector<1x8xf32>
    %91 = vector.extract_strided_slice %4 {offsets = [0, 2], sizes = [8, 1], strides = [1, 1]} : vector<8x8xf32> to vector<8x1xf32>
    %92 = vector.broadcast %90 : vector<1x8xf32> to vector<8x8xf32>
    %93 = vector.broadcast %91 : vector<8x1xf32> to vector<8x8xf32>
    %94 = arith.mulf %92, %93 : vector<8x8xf32>
    %95 = arith.addf %89, %94 : vector<8x8xf32>
    %96 = vector.extract_strided_slice %78 {offsets = [3, 0], sizes = [1, 8], strides = [1, 1]} : vector<8x8xf32> to vector<1x8xf32>
    %97 = vector.extract_strided_slice %4 {offsets = [0, 3], sizes = [8, 1], strides = [1, 1]} : vector<8x8xf32> to vector<8x1xf32>
    %98 = vector.broadcast %96 : vector<1x8xf32> to vector<8x8xf32>
    %99 = vector.broadcast %97 : vector<8x1xf32> to vector<8x8xf32>
    %100 = arith.mulf %98, %99 : vector<8x8xf32>
    %101 = arith.addf %95, %100 : vector<8x8xf32>
    %102 = vector.extract_strided_slice %78 {offsets = [4, 0], sizes = [1, 8], strides = [1, 1]} : vector<8x8xf32> to vector<1x8xf32>
    %103 = vector.extract_strided_slice %4 {offsets = [0, 4], sizes = [8, 1], strides = [1, 1]} : vector<8x8xf32> to vector<8x1xf32>
    %104 = vector.broadcast %102 : vector<1x8xf32> to vector<8x8xf32>
    %105 = vector.broadcast %103 : vector<8x1xf32> to vector<8x8xf32>
    %106 = arith.mulf %104, %105 : vector<8x8xf32>
    %107 = arith.addf %101, %106 : vector<8x8xf32>
    %108 = vector.broadcast %5 : vector<8x1xf32> to vector<8x8xf32>
    %109 = arith.addf %107, %108 : vector<8x8xf32>
    %110 = vector.extract_strided_slice %109 {offsets = [0, 0], sizes = [4, 8], strides = [1, 1]} : vector<8x8xf32> to vector<4x8xf32>
    %c0_14 = arith.constant 0 : index
    %c0_15 = arith.constant 0 : index
    %111 = vector.load %arg8[%c0_14, %c0_15] : memref<4x8xf32, #tpu.memory_space<vmem>>, vector<4x8xf32>
    tpu.vector_store %arg8[%c0_14, %c0_15], %110 {strides = array<i32>} : memref<4x8xf32, #tpu.memory_space<vmem>>, vector<4x8xf32>,
    return
  }
  func.func @transform_0(%arg0: i32) -> (i32, i32) {
    %c0_i32 = arith.constant 0 : i32
    %c0_i32_0 = arith.constant 0 : i32
    return %c0_i32, %arg0 : i32, i32
  }
  func.func @transform_1(%arg0: i32) -> (i32, i32) {
    %c0_i32 = arith.constant 0 : i32
    %c0_i32_0 = arith.constant 0 : i32
    %c0_i32_1 = arith.constant 0 : i32
    return %c0_i32, %c0_i32_0 : i32, i32
  }
  func.func @transform_2(%arg0: i32) -> (i32, i32) {
    %c0_i32 = arith.constant 0 : i32
    %c0_i32_0 = arith.constant 0 : i32
    %c0_i32_1 = arith.constant 0 : i32
    return %c0_i32, %c0_i32_0 : i32, i32
  }
  func.func @transform_3(%arg0: i32) -> (i32, i32) {
    %c0_i32 = arith.constant 0 : i32
    %c0_i32_0 = arith.constant 0 : i32
    %c0_i32_1 = arith.constant 0 : i32
    return %c0_i32, %c0_i32_0 : i32, i32
  }
  func.func @transform_4(%arg0: i32) -> (i32, i32) {
    %c0_i32 = arith.constant 0 : i32
    %c0_i32_0 = arith.constant 0 : i32
    %c0_i32_1 = arith.constant 0 : i32
    return %c0_i32, %c0_i32_0 : i32, i32
  }
  func.func @transform_5(%arg0: i32) -> (i32, i32) {
    %c0_i32 = arith.constant 0 : i32
    %c0_i32_0 = arith.constant 0 : i32
    %c0_i32_1 = arith.constant 0 : i32
    return %c0_i32, %c0_i32_0 : i32, i32
  }
  func.func @transform_6(%arg0: i32) -> (i32, i32) {
    %c0_i32 = arith.constant 0 : i32
    %c0_i32_0 = arith.constant 0 : i32
    %c0_i32_1 = arith.constant 0 : i32
    return %c0_i32, %c0_i32_0 : i32, i32
  }
  func.func @transform_7(%arg0: i32) -> (i32, i32) {
    %c0_i32 = arith.constant 0 : i32
    %c0_i32_0 = arith.constant 0 : i32
    return %c0_i32, %arg0 : i32, i32
  }
}

</mosaic_0001>

<bundles_post_ra>
// kernel: sas_model_forward_fb.1
= control target key start
LH: loop header
LB: loop body
LE: loop exit
PB: predicated region body
PF: predicated region fallthrough
CT: control target
= control target key end

     0   :  { %v286_v1 = vmov 0   ;;  %v287_v2 = vmov 2   ;;  %s381_s0 = inlined_call_operand.vmem [shape: f32[5,8], index: 0, kind: input, shape index: {}]   ;;  %s382_s1 = inlined_call_operand.vmem [shape: f32[8,8], index: 1, kind: input, shape index: {}]   ;;  %s383_s2 = inlined_call_operand.vmem [shape: f32[8,1], index: 2, kind: input, shape index: {}]   ;;  %s384_s3 = inlined_call_operand.vmem [shape: f32[8,8], index: 3, kind: input, shape index: {}]   ;;  %s385_s4 = inlined_call_operand.vmem [shape: f32[8,1], index: 4, kind: input, shape index: {}]   ;;  %s386_s5 = inlined_call_operand.vmem [shape: f32[8,8], index: 5, kind: input, shape index: {}]   ;;  %s387_s6 = inlined_call_operand.vmem [shape: f32[8,1], index: 6, kind: input, shape index: {}]   ;;  %s388_s7 = inlined_call_operand.hbm [shape: f32[4,8], index: 7, kind: output, shape index: {}]  }
   0x1   :  { %v27_v0 = vld [vmem:[%s382_s1] sm:$0xff]  ;;  %238 = vset.pattern.permute.xlu0 %v286_v1  ;;  %240 = vset.pattern.permute.xlu1 %v287_v2 }
   0x2   :  { %40 = vperm.xlu0 %238, %v27_v0   ;;  %59 = vperm.xlu1 %240, %v27_v0  }
   0x3   :  { %12 = vsyncpa [#allocation3], 0  ;;  %v288_v3 = vmov 1   ;;  %v289_v4 = vmov 3   ;;  %v28_v5 = vld [vmem:[%s383_s2] sm:$0xff]  ;;  %v290_v6 = vmov 4   ;;  %v34_v11 = vlaneseq }
   0x4   :  { %v29_v7 = vld [vmem:[%s384_s3] sm:$0xff]  ;;  %vm214_vm0 = vcmask 60416  }
   0x5   :  { %v30_v8 = vld [vmem:[%s385_s4] sm:$0xff]  ;;  %v35_v12 = vshrl.u32 %v34_v11, 7 }
   0x6   :  { %239 = vset.pattern.permute.xlu0 %v288_v3  ;;  %241 = vset.pattern.permute.xlu1 %v289_v4  ;;  %v31_v9 = vld [vmem:[%s386_s5] sm:$0xff] }
   0x7   :  { %49 = vperm.xlu0 %239, %v27_v0   ;;  %69 = vperm.xlu1 %241, %v27_v0   ;;  %v32_v10 = vld [vmem:[%s387_s6] sm:$0xff]  ;;  %v350_v13 = vsub.s32 0, %v35_v12  ;;  %v352_v14 = vsub.s32 1, %v35_v12  ;;  %v357_v17 = vsub.s32 2, %v35_v12  ;;  %v361_v21 = vsub.s32 3, %v35_v12 }
   0x8   :  { %v33_v15 = vld [vmem:[%s381_s0] sm:$0x1f]  ;;  %v363_v22 = vsub.s32 4, %v35_v12  ;;  %s291_s0 = smov [#allocation2]  }
   0x9   :  { %v37_v19 = vrot.slane %v33_v15, %v350_v13  ;;  %v47_v20 = vrot.slane %v33_v15, %v352_v14  ;;  %v57_v23 = vrot.slane %v33_v15, %v357_v17  ;;  %v67_v28 = vrot.slane %v33_v15, %v361_v21  ;;  %s222_s6 = sshll.u32 %s291_s0, 4  ;;  %s223_s6 = int_to_ptr.vmem [resolvable:$true] %s222_s6 }
   0xa   :  { %v77_v29 = vrot.slane %v33_v15, %v363_v22  ;;  %s264_s10 = scalar_lea.vmem %s223_s6, 64  ;;  %p269_p1 = scmp.lt.s32.totalorder %s223_s6, %s223_s6 }
   0xb   :  { %242 = vset.pattern.permute.xlu1 %v290_v6  ;;  %243 = vset.pattern.permute.xlu0 %v286_v1  ;;  %p265_p0 = scmp.ne.s32.totalorder %s223_s6, %s264_s10  ;;  %p270_p2 = scmp.lt.s32.totalorder %s264_s10, %s264_s10 }
   0xc   :  { %79 = vperm.xlu1 %242, %v27_v0   ;;  %86 = vperm.xlu0 %243, %v28_v5  }
   0xd   :  { %p271_p3 = por %p270_p2, %p269_p1 }
   0xf   :  { %p272_p4 = pnand %p271_p3, %p265_p0 }
  0x10   :  { %244 = vset.pattern.permute.xlu1 %v286_v1  ;;  %246 = vset.pattern.permute.xlu0 %v287_v2 }
  0x11   :  { %102 = vperm.xlu1 %244, %v29_v7   ;;  %121 = vperm.xlu0 %246, %v29_v7  }
  0x15   :  { %245 = vset.pattern.permute.xlu1 %v288_v3  ;;  %249 = vset.pattern.permute.xlu0 %v286_v1 }
  0x16   :  { %111 = vperm.xlu1 %245, %v29_v7   ;;  %148 = vperm.xlu0 %249, %v30_v8  }
  0x1a   :  { %247 = vset.pattern.permute.xlu1 %v289_v4  ;;  %252 = vset.pattern.permute.xlu0 %v287_v2 }
  0x1b   :  { %131 = vperm.xlu1 %247, %v29_v7   ;;  %183 = vperm.xlu0 %252, %v31_v9  }
  0x1f   :  { %248 = vset.pattern.permute.xlu1 %v290_v6  ;;  %255 = vset.pattern.permute.xlu0 %v286_v1 }
  0x20   :  { %141 = vperm.xlu1 %248, %v29_v7   ;;  %210 = vperm.xlu0 %255, %v32_v10  }
  0x24   :  { %250 = vset.pattern.permute.xlu1 %v286_v1 }
  0x25   :  { %164 = vperm.xlu1 %250, %v31_v9  }
  0x29   :  { %251 = vset.pattern.permute.xlu1 %v288_v3 }
  0x2a   :  { %173 = vperm.xlu1 %251, %v31_v9  }
  0x2e   :  { %253 = vset.pattern.permute.xlu1 %v289_v4 }
  0x2f   :  { %193 = vperm.xlu1 %253, %v31_v9  }
  0x33   :  { %254 = vset.pattern.permute.xlu1 %v290_v6 }
  0x34   :  { %203 = vperm.xlu1 %254, %v31_v9  }
  0x7d   :  { %v41_v16 = vpop.permute.xlu0 %40  ;;  %v60_v18 = vpop.permute.xlu1 %59 }
  0x7e   :  { %v43_v26 = vmul.f32 %v41_v16, %v37_v19  ;;  %v62_v30 = vmul.f32 %v60_v18, %v57_v23 }
  0x82   :  { %v50_v24 = vpop.permute.xlu0 %49  ;;  %v70_v25 = vpop.permute.xlu1 %69 }
  0x83   :  { %v52_v27 = vmul.f32 %v50_v24, %v47_v20  ;;  %v72_v33 = vmul.f32 %v70_v25, %v67_v28 }
  0x85   :  { %v53_v31 = vadd.f32 %v52_v27, %v43_v26 }
  0x87   :  { %v63_v32 = vadd.f32 %v62_v30, %v53_v31  ;;  %v80_v34 = vpop.permute.xlu1 %79  ;;  %v87_v37 = vpop.permute.xlu0 %86 }
  0x88   :  { %v82_v35 = vmul.f32 %v80_v34, %v77_v29 }
  0x89   :  { %v73_v36 = vadd.f32 %v72_v33, %v63_v32 }
  0x8b   :  { %v83_v38 = vadd.f32 %v82_v35, %v73_v36 }
  0x8c   :  { %v103_v43 = vpop.permute.xlu1 %102  ;;  %v122_v50 = vpop.permute.xlu0 %121 }
  0x8d   :  { %v89_v39 = vadd.f32 %v87_v37, %v83_v38 }
  0x8f   :  { %v230_v40 = vmul.f32 -1.442695, %v89_v39 }
  0x91   :  { %256 = vpow2.f32 %v230_v40  ;;  %v112_v44 = vpop.permute.xlu1 %111  ;;  %v149_v62 = vpop.permute.xlu0 %148 }
  0x96   :  { %v132_v46 = vpop.permute.xlu1 %131  ;;  %v184_v11 = vpop.permute.xlu0 %183 }
  0x9b   :  { %v142_v57 = vpop.permute.xlu1 %141  ;;  %v211_v28 = vpop.permute.xlu0 %210 }
  0x9e   :  { %v257_v41 = vpop.eup %256 }
  0x9f   :  { %v93_v42 = vadd.f32 1.0, %v257_v41 }
  0xa0   :  { %v165_v4 = vpop.permute.xlu1 %164 }
  0xa1   :  { %258 = vrcp.f32 %v93_v42 }
  0xa5   :  { %v174_v5 = vpop.permute.xlu1 %173 }
  0xaa   :  { %v194_v7 = vpop.permute.xlu1 %193 }
  0xae   :  { %v259_v45 = vpop.eup %258 }
  0xaf   :  { %v99_v47 = vrot.slane %v259_v45, %v350_v13  ;;  %v109_v48 = vrot.slane %v259_v45, %v352_v14  ;;  %v119_v49 = vrot.slane %v259_v45, %v357_v17  ;;  %v129_v53 = vrot.slane %v259_v45, %v361_v21  ;;  %v204_v23 = vpop.permute.xlu1 %203 }
  0xb0   :  { %v139_v55 = vrot.slane %v259_v45, %v363_v22 }
  0xb1   :  { %v105_v51 = vmul.f32 %v103_v43, %v99_v47  ;;  %v114_v52 = vmul.f32 %v112_v44, %v109_v48  ;;  %v124_v56 = vmul.f32 %v122_v50, %v119_v49  ;;  %v134_v58 = vmul.f32 %v132_v46, %v129_v53 }
  0xb2   :  { %v144_v60 = vmul.f32 %v142_v57, %v139_v55 }
  0xb3   :  { %v115_v54 = vadd.f32 %v114_v52, %v105_v51 }
  0xb5   :  { %v125_v59 = vadd.f32 %v124_v56, %v115_v54 }
  0xb7   :  { %v135_v61 = vadd.f32 %v134_v58, %v125_v59 }
  0xb9   :  { %v145_v63 = vadd.f32 %v144_v60, %v135_v61 }
  0xbb   :  { %v151_v0 = vadd.f32 %v149_v62, %v145_v63 }
  0xbd   :  { %v231_v1 = vmul.f32 -1.442695, %v151_v0 }
  0xbf   :  { %260 = vpow2.f32 %v231_v1 }
  0xcc   :  { %v261_v2 = vpop.eup %260 }
  0xcd   :  { %v155_v3 = vadd.f32 1.0, %v261_v2 }
  0xcf   :  { %262 = vrcp.f32 %v155_v3 }
  0xdc   :  { %v263_v6 = vpop.eup %262 }
  0xdd   :  { %v161_v8 = vrot.slane %v263_v6, %v350_v13  ;;  %v171_v9 = vrot.slane %v263_v6, %v352_v14  ;;  %v181_v10 = vrot.slane %v263_v6, %v357_v17  ;;  %v191_v16 = vrot.slane %v263_v6, %v361_v21 }
  0xde   :  { %v201_v19 = vrot.slane %v263_v6, %v363_v22 }
  0xdf   :  { %v167_v12 = vmul.f32 %v165_v4, %v161_v8  ;;  %v176_v15 = vmul.f32 %v174_v5, %v171_v9  ;;  %v186_v20 = vmul.f32 %v184_v11, %v181_v10  ;;  %v196_v24 = vmul.f32 %v194_v7, %v191_v16 }
  0xe0   :  { %v206_v26 = vmul.f32 %v204_v23, %v201_v19 }
  0xe1   :  { %v177_v18 = vadd.f32 %v176_v15, %v167_v12 }
  0xe3   :  { %v187_v25 = vadd.f32 %v186_v20, %v177_v18 }
  0xe5   :  { %v197_v27 = vadd.f32 %v196_v24, %v187_v25 }
  0xe7   :  { %v207_v13 = vadd.f32 %v206_v26, %v197_v27 }
  0xe9   :  { %v213_v14 = vadd.f32 %v211_v28, %v207_v13 }
  0xeb   :  { %215 = vst.msk [vmem:[#allocation2] sm:$0xf] %vm214_vm0, %v213_v14 }
  0xec   :  { %275 = shalt.err (!%p272_p4)
}
  0xed   :  { %225 = dma.vmem_to_hbm [thread:$0]  %s223_s6, 64, %s388_s7, [#allocation3]  }
  0xee   :  { %284 = dma.done.wait [#allocation3], 64  }
  0xef   :  { %285 = vsyncadd [#allocation3], 4294967232 }
  0xf0   :  { %229 = vsyncpa [#allocation3], 1 }

</bundles_post_ra>
